<compile_context>
chip_gen: v5e
topology: v5e:2x2
jax: 0.10.0
libtpu: 0.0.40
codegen_flags: <defaults>
</compile_context>

<pallas_src>
import functools
import math

import jax
import jax.numpy as jnp
from jax.experimental import pallas as pl
from jax.experimental.pallas import tpu as pltpu


def _round_up(x, m):
    return ((x + m - 1) // m) * m


def _stacked_lstm_kernel(x_ref, h0_ref, c0_ref, w_ref, b_ref,
                         h1_ref, c1_ref, xh_scratch,
                         *, k_in_pad, h_pad):
    """One grid step = one LSTMCell layer; layer input carried in VMEM scratch."""
    layer = pl.program_id(0)
    k_tot = k_in_pad + h_pad

    # Layer 0: load the external input into the carried x slot.
    @pl.when(layer == 0)
    def _():
        xh_scratch[:, 0:k_in_pad] = x_ref[...]

    # Place this layer's previous hidden state next to x: xh = [x_l | h_prev_l].
    xh_scratch[:, k_in_pad:k_tot] = h0_ref[0]

    # Single fused matmul over the concatenated K axis (MXU, f32 accumulation).
    gates = jnp.dot(xh_scratch[...], w_ref[0],
                    preferred_element_type=jnp.float32) + b_ref[0]

    # Gate order [i, f, g, o]; each gate is a 128-lane-aligned slab of width h_pad.
    i_g = jax.nn.sigmoid(gates[:, 0 * h_pad:1 * h_pad])
    f_g = jax.nn.sigmoid(gates[:, 1 * h_pad:2 * h_pad])
    g_g = jnp.tanh(gates[:, 2 * h_pad:3 * h_pad])
    o_g = jax.nn.sigmoid(gates[:, 3 * h_pad:4 * h_pad])

    c_prev = c0_ref[0].astype(jnp.float32)
    c_new = f_g * c_prev + i_g * g_g
    h_new = o_g * jnp.tanh(c_new)

    h1_ref[0] = h_new.astype(h1_ref.dtype)
    c1_ref[0] = c_new.astype(c1_ref.dtype)

    # Carry h_new as the next layer's input. Weight rows beyond this layer's
    # true input width are zero, so any stale data past h_pad is harmless.
    @pl.when(layer + 1 < pl.num_programs(0))
    def _():
        xh_scratch[:, 0:h_pad] = h_new.astype(xh_scratch.dtype)


class StackedLSTM:
    """JAX/Pallas port of onmt.Models.StackedLSTM (forward only, eval mode)."""

    def __init__(self, num_layers, input_size, rnn_size, dropout, key):
        self.num_layers = num_layers
        self.input_size = input_size
        self.rnn_size = rnn_size
        # TODO(synk): training-time dropout between layers not applied (eval-mode identity).
        self.dropout = dropout

        H = rnn_size
        self.h_pad = _round_up(H, 128)
        self.k_in_pad = _round_up(max(input_size, H), 128)
        self.k_tot = self.k_in_pad + self.h_pad

        bound = 1.0 / math.sqrt(H)
        self.layers_f32 = []          # per-layer (w_ih_t, w_hh_t, bias_row), f32, for reference
        w_stack, b_stack = [], []
        d_in = input_size
        for _ in range(num_layers):
            key, k1, k2, k3, k4 = jax.random.split(key, 5)
            # PyTorch LSTMCell: W_ih (4H, D_in), W_hh (4H, H); stored transposed.
            w_ih_t = jax.random.uniform(k1, (d_in, 4 * H), jnp.float32, -bound, bound)
            w_hh_t = jax.random.uniform(k2, (H, 4 * H), jnp.float32, -bound, bound)
            b_ih = jax.random.uniform(k3, (4 * H,), jnp.float32, -bound, bound)
            b_hh = jax.random.uniform(k4, (4 * H,), jnp.float32, -bound, bound)
            bias = (b_ih + b_hh).reshape(1, 4 * H)
            self.layers_f32.append((w_ih_t, w_hh_t, bias))

            # Fused, gate-column-padded, layer-stacked weight.
            w_comb = jnp.zeros((self.k_tot, 4 * self.h_pad), jnp.float32)
            b_comb = jnp.zeros((1, 4 * self.h_pad), jnp.float32)
            for g in range(4):
                cols = slice(g * self.h_pad, g * self.h_pad + H)
                w_comb = w_comb.at[0:d_in, cols].set(w_ih_t[:, g * H:(g + 1) * H])
                w_comb = w_comb.at[self.k_in_pad:self.k_in_pad + H, cols].set(
                    w_hh_t[:, g * H:(g + 1) * H])
                b_comb = b_comb.at[:, cols].set(bias[:, g * H:(g + 1) * H])
            w_stack.append(w_comb.astype(jnp.bfloat16))
            b_stack.append(b_comb)
            d_in = H

        self.w_all = jnp.stack(w_stack)   # (L, k_tot, 4*h_pad) bf16
        self.b_all = jnp.stack(b_stack)   # (L, 1, 4*h_pad)     f32

    def __call__(self, x, hidden):
        h_0, c_0 = hidden                 # each (L, B, H)
        L, H = self.num_layers, self.rnn_size
        B = x.shape[0]
        Hp, Kp, Kt = self.h_pad, self.k_in_pad, self.k_tot

        # Pad to lane-aligned widths; weights' padding rows/cols are zero so this is exact.
        x_pad = jnp.zeros((B, Kp), jnp.bfloat16).at[:, :self.input_size].set(
            x.astype(jnp.bfloat16))
        h0_pad = jnp.zeros((L, B, Hp), jnp.bfloat16).at[:, :, :H].set(
            h_0.astype(jnp.bfloat16))
        c0_pad = jnp.zeros((L, B, Hp), jnp.float32).at[:, :, :H].set(
            c_0.astype(jnp.float32))

        kernel = functools.partial(_stacked_lstm_kernel, k_in_pad=Kp, h_pad=Hp)

        cost = pl.CostEstimate(
            flops=int(L * 2 * B * Kt * 4 * Hp),
            transcendentals=int(L * 5 * B * Hp),
            bytes_accessed=int(self.w_all.size * 2 + self.b_all.size * 4
                               + x_pad.size * 2 + h0_pad.size * 2
                               + c0_pad.size * 4 + 2 * L * B * Hp * 4))

        h1_pad, c1_pad = pl.pallas_call(
            kernel,
            out_shape=(jax.ShapeDtypeStruct((L, B, Hp), jnp.float32),
                       jax.ShapeDtypeStruct((L, B, Hp), jnp.float32)),
            grid=(L,),
            in_specs=[
                pl.BlockSpec((B, Kp), lambda l: (0, 0)),           # x (resident)
                pl.BlockSpec((1, B, Hp), lambda l: (l, 0, 0)),     # h_0[l]
                pl.BlockSpec((1, B, Hp), lambda l: (l, 0, 0)),     # c_0[l]
                pl.BlockSpec((1, Kt, 4 * Hp), lambda l: (l, 0, 0)),  # W_comb[l]
                pl.BlockSpec((1, 1, 4 * Hp), lambda l: (l, 0, 0)),   # bias[l]
            ],
            out_specs=(
                pl.BlockSpec((1, B, Hp), lambda l: (l, 0, 0)),
                pl.BlockSpec((1, B, Hp), lambda l: (l, 0, 0)),
            ),
            scratch_shapes=[pltpu.VMEM((B, Kt), jnp.bfloat16)],    # [x | h] carry
            compiler_params=pltpu.CompilerParams(
                dimension_semantics=("arbitrary",),
                vmem_limit_bytes=32 * 1024 * 1024),
            cost_estimate=cost,
        )(x_pad, h0_pad, c0_pad, self.w_all, self.b_all)

        h_1 = h1_pad[:, :, :H]
        c_1 = c1_pad[:, :, :H]
        return h_1[-1], (h_1, c_1)


def _reference_forward(model, x, h_0, c_0):
    """Pure-JAX reference with matching bf16 rounding on weights/activations."""
    H = model.rnn_size

    def bf(v):
        return v.astype(jnp.bfloat16).astype(jnp.float32)

    xi = x
    h1, c1 = [], []
    for i, (w_ih_t, w_hh_t, bias) in enumerate(model.layers_f32):
        gates = bf(xi) @ bf(w_ih_t) + bf(h_0[i]) @ bf(w_hh_t) + bias
        i_g = jax.nn.sigmoid(gates[:, 0 * H:1 * H])
        f_g = jax.nn.sigmoid(gates[:, 1 * H:2 * H])
        g_g = jnp.tanh(gates[:, 2 * H:3 * H])
        o_g = jax.nn.sigmoid(gates[:, 3 * H:4 * H])
        c_new = f_g * c_0[i] + i_g * g_g
        h_new = o_g * jnp.tanh(c_new)
        xi = h_new
        h1.append(h_new)
        c1.append(c_new)
    return xi, (jnp.stack(h1), jnp.stack(c1))


if __name__ == "__main__":
    num_layers = 2
    batch = 8
    input_size = 32
    rnn_size = 32

    key = jax.random.PRNGKey(0)
    key, kx, kh, kc, kp = jax.random.split(key, 5)

    x = jax.random.normal(kx, (batch, input_size), jnp.float32)
    h_0 = jax.random.normal(kh, (num_layers, batch, rnn_size), jnp.float32)
    c_0 = jax.random.normal(kc, (num_layers, batch, rnn_size), jnp.float32)

    model = StackedLSTM(num_layers, input_size, rnn_size, dropout=0.3, key=kp)

    out, (h_1, c_1) = model(x, (h_0, c_0))
    jax.block_until_ready((out, h_1, c_1))

    assert out.shape == (batch, rnn_size)
    assert h_1.shape == (num_layers, batch, rnn_size)
    assert c_1.shape == (num_layers, batch, rnn_size)

    ref_out, (ref_h, ref_c) = _reference_forward(model, x, h_0, c_0)
    for got, want in ((out, ref_out), (h_1, ref_h), (c_1, ref_c)):
        err = float(jnp.max(jnp.abs(got - want)))
        assert err < 2e-2, f"max abs err {err}"

    print("KERNEL_OK")
</pallas_src>

<mosaic_0001>
module attributes {stable_mosaic.version = 11 : i64} {
  func.func @_stacked_lstm_kernel(%arg0: i32, %arg1: memref<8x128xbf16, #tpu.memory_space<vmem>>, %arg2: memref<1x8x128xbf16, #tpu.memory_space<vmem>>, %arg3: memref<1x8x128xf32, #tpu.memory_space<vmem>>, %arg4: memref<1x256x512xbf16, #tpu.memory_space<vmem>>, %arg5: memref<1x1x512xf32, #tpu.memory_space<vmem>>, %arg6: memref<1x8x128xf32, #tpu.memory_space<vmem>>, %arg7: memref<1x8x128xf32, #tpu.memory_space<vmem>>, %arg8: memref<8x256xbf16, #tpu.memory_space<vmem>>) attributes {dimension_semantics = [#tpu.dimension_semantics<arbitrary>], iteration_bounds = array<i64: 2>, scalar_prefetch = 0 : i64, scratch_operands = 1 : i64, tpu.core_type = #tpu.core_type<tc>, window_params = [{pipeline_mode = #tpu.pipeline_mode<synchronous>, transform_indices = @transform_0, window_bounds = array<i64: 8, 128>}, {transform_indices = @transform_1, window_bounds = array<i64: 1, 8, 128>}, {transform_indices = @transform_2, window_bounds = array<i64: 1, 8, 128>}, {transform_indices = @transform_3, window_bounds = array<i64: 1, 256, 512>}, {transform_indices = @transform_4, window_bounds = array<i64: 1, 1, 512>}, {transform_indices = @transform_5, window_bounds = array<i64: 1, 8, 128>}, {transform_indices = @transform_6, window_bounds = array<i64: 1, 8, 128>}]} {
    %c0_i32 = arith.constant 0 : i32
    %0 = arith.cmpi eq, %arg0, %c0_i32 : i32
    %1 = arith.extui %0 : i1 to i32
    %c0_i32_0 = arith.constant 0 : i32
    %2 = arith.cmpi ne, %1, %c0_i32_0 : i32
    scf.if %2 {
      %c0_25 = arith.constant 0 : index
      %c0_26 = arith.constant 0 : index
      %51 = vector.load %arg1[%c0_25, %c0_26] : memref<8x128xbf16, #tpu.memory_space<vmem>>, vector<8x128xbf16>
      %c0_27 = arith.constant 0 : index
      %c0_28 = arith.constant 0 : index
      %52 = vector.load %arg8[%c0_27, %c0_28] : memref<8x256xbf16, #tpu.memory_space<vmem>>, vector<8x128xbf16>
      tpu.vector_store %arg8[%c0_27, %c0_28], %51 {strides = array<i32>} : memref<8x256xbf16, #tpu.memory_space<vmem>>, vector<8x128xbf16>,
    } else {
    }
    %c0 = arith.constant 0 : index
    %c0_1 = arith.constant 0 : index
    %c0_2 = arith.constant 0 : index
    %3 = vector.load %arg2[%c0, %c0_1, %c0_2] : memref<1x8x128xbf16, #tpu.memory_space<vmem>>, vector<1x8x128xbf16>
    %4 = vector.shape_cast %3 : vector<1x8x128xbf16> to vector<8x128xbf16>
    %c0_3 = arith.constant 0 : index
    %c128 = arith.constant 128 : index
    %5 = vector.load %arg8[%c0_3, %c128] : memref<8x256xbf16, #tpu.memory_space<vmem>>, vector<8x128xbf16>
    tpu.vector_store %arg8[%c0_3, %c128], %4 {strides = array<i32>} : memref<8x256xbf16, #tpu.memory_space<vmem>>, vector<8x128xbf16>,
    %c0_4 = arith.constant 0 : index
    %c0_5 = arith.constant 0 : index
    %6 = vector.load %arg8[%c0_4, %c0_5] : memref<8x256xbf16, #tpu.memory_space<vmem>>, vector<8x256xbf16>
    %c0_6 = arith.constant 0 : index
    %c0_7 = arith.constant 0 : index
    %c0_8 = arith.constant 0 : index
    %7 = vector.load %arg4[%c0_6, %c0_7, %c0_8] : memref<1x256x512xbf16, #tpu.memory_space<vmem>>, vector<1x256x512xbf16>
    %8 = vector.shape_cast %7 : vector<1x256x512xbf16> to vector<256x512xbf16>
    %cst = arith.constant dense<0.000000e+00> : vector<8x512xf32>
    %9 = tpu.matmul %6, %8, %cst {dimension_numbers = #tpu.dot_dimension_numbers<[1], [0], [0], [1], [0, 0, 1, 1], [], []>} : vector<8x256xbf16>, vector<256x512xbf16>, vector<8x512xf32> -> vector<8x512xf32>
    %c0_9 = arith.constant 0 : index
    %c0_10 = arith.constant 0 : index
    %c0_11 = arith.constant 0 : index
    %10 = vector.load %arg5[%c0_9, %c0_10, %c0_11] : memref<1x1x512xf32, #tpu.memory_space<vmem>>, vector<1x1x512xf32>
    %11 = vector.shape_cast %10 : vector<1x1x512xf32> to vector<1x512xf32>
    %12 = vector.broadcast %11 : vector<1x512xf32> to vector<8x512xf32>
    %13 = arith.addf %9, %12 : vector<8x512xf32>
    %14 = vector.extract_strided_slice %13 {offsets = [0, 0], sizes = [8, 128], strides = [1, 1]} : vector<8x512xf32> to vector<8x128xf32>
    %15 = arith.negf %14 : vector<8x128xf32>
    %16 = math.exp %15 : vector<8x128xf32>
    %cst_12 = arith.constant 1.000000e+00 : f32
    %17 = vector.broadcast %cst_12 : f32 to vector<8x128xf32>
    %18 = arith.addf %17, %16 : vector<8x128xf32>
    %19 = arith.divf %17, %18 : vector<8x128xf32>
    %20 = vector.extract_strided_slice %13 {offsets = [0, 128], sizes = [8, 128], strides = [1, 1]} : vector<8x512xf32> to vector<8x128xf32>
    %21 = arith.negf %20 : vector<8x128xf32>
    %22 = math.exp %21 : vector<8x128xf32>
    %cst_13 = arith.constant 1.000000e+00 : f32
    %23 = vector.broadcast %cst_13 : f32 to vector<8x128xf32>
    %24 = arith.addf %23, %22 : vector<8x128xf32>
    %25 = arith.divf %23, %24 : vector<8x128xf32>
    %26 = vector.extract_strided_slice %13 {offsets = [0, 256], sizes = [8, 128], strides = [1, 1]} : vector<8x512xf32> to vector<8x128xf32>
    %27 = math.tanh %26 : vector<8x128xf32>
    %28 = vector.extract_strided_slice %13 {offsets = [0, 384], sizes = [8, 128], strides = [1, 1]} : vector<8x512xf32> to vector<8x128xf32>
    %29 = arith.negf %28 : vector<8x128xf32>
    %30 = math.exp %29 : vector<8x128xf32>
    %cst_14 = arith.constant 1.000000e+00 : f32
    %31 = vector.broadcast %cst_14 : f32 to vector<8x128xf32>
    %32 = arith.addf %31, %30 : vector<8x128xf32>
    %33 = arith.divf %31, %32 : vector<8x128xf32>
    %c0_15 = arith.constant 0 : index
    %c0_16 = arith.constant 0 : index
    %c0_17 = arith.constant 0 : index
    %34 = vector.load %arg3[%c0_15, %c0_16, %c0_17] : memref<1x8x128xf32, #tpu.memory_space<vmem>>, vector<1x8x128xf32>
    %35 = vector.shape_cast %34 : vector<1x8x128xf32> to vector<8x128xf32>
    %36 = arith.mulf %25, %35 : vector<8x128xf32>
    %37 = arith.mulf %19, %27 : vector<8x128xf32>
    %38 = arith.addf %36, %37 : vector<8x128xf32>
    %39 = math.tanh %38 : vector<8x128xf32>
    %40 = arith.mulf %33, %39 : vector<8x128xf32>
    %c0_18 = arith.constant 0 : index
    %c0_19 = arith.constant 0 : index
    %c0_20 = arith.constant 0 : index
    %41 = vector.load %arg6[%c0_18, %c0_19, %c0_20] : memref<1x8x128xf32, #tpu.memory_space<vmem>>, vector<1x8x128xf32>
    %42 = vector.shape_cast %41 : vector<1x8x128xf32> to vector<8x128xf32>
    %43 = vector.shape_cast %40 : vector<8x128xf32> to vector<1x8x128xf32>
    tpu.vector_store %arg6[%c0_18, %c0_19, %c0_20], %43 {strides = array<i32>} : memref<1x8x128xf32, #tpu.memory_space<vmem>>, vector<1x8x128xf32>,
    %c0_21 = arith.constant 0 : index
    %c0_22 = arith.constant 0 : index
    %c0_23 = arith.constant 0 : index
    %44 = vector.load %arg7[%c0_21, %c0_22, %c0_23] : memref<1x8x128xf32, #tpu.memory_space<vmem>>, vector<1x8x128xf32>
    %45 = vector.shape_cast %44 : vector<1x8x128xf32> to vector<8x128xf32>
    %46 = vector.shape_cast %38 : vector<8x128xf32> to vector<1x8x128xf32>
    tpu.vector_store %arg7[%c0_21, %c0_22, %c0_23], %46 {strides = array<i32>} : memref<1x8x128xf32, #tpu.memory_space<vmem>>, vector<1x8x128xf32>,
    %c1_i32 = arith.constant 1 : i32
    %47 = arith.addi %arg0, %c1_i32 : i32
    %c2_i32 = arith.constant 2 : i32
    %48 = arith.cmpi slt, %47, %c2_i32 : i32
    %49 = arith.extui %48 : i1 to i32
    %c0_i32_24 = arith.constant 0 : i32
    %50 = arith.cmpi ne, %49, %c0_i32_24 : i32
    scf.if %50 {
      %51 = arith.truncf %40 : vector<8x128xf32> to vector<8x128xbf16>
      %c0_25 = arith.constant 0 : index
      %c0_26 = arith.constant 0 : index
      %52 = vector.load %arg8[%c0_25, %c0_26] : memref<8x256xbf16, #tpu.memory_space<vmem>>, vector<8x128xbf16>
      tpu.vector_store %arg8[%c0_25, %c0_26], %51 {strides = array<i32>} : memref<8x256xbf16, #tpu.memory_space<vmem>>, vector<8x128xbf16>,
    } else {
    }
    return
  }
  func.func @transform_0(%arg0: i32) -> (i32, i32) {
    %c0_i32 = arith.constant 0 : i32
    %c0_i32_0 = arith.constant 0 : i32
    %c0_i32_1 = arith.constant 0 : i32
    return %c0_i32, %c0_i32_0 : i32, i32
  }
  func.func @transform_1(%arg0: i32) -> (i32, i32, i32) {
    %c0_i32 = arith.constant 0 : i32
    %c0_i32_0 = arith.constant 0 : i32
    %c0_i32_1 = arith.constant 0 : i32
    return %arg0, %c0_i32, %c0_i32_0 : i32, i32, i32
  }
  func.func @transform_2(%arg0: i32) -> (i32, i32, i32) {
    %c0_i32 = arith.constant 0 : i32
    %c0_i32_0 = arith.constant 0 : i32
    %c0_i32_1 = arith.constant 0 : i32
    return %arg0, %c0_i32, %c0_i32_0 : i32, i32, i32
  }
  func.func @transform_3(%arg0: i32) -> (i32, i32, i32) {
    %c0_i32 = arith.constant 0 : i32
    %c0_i32_0 = arith.constant 0 : i32
    %c0_i32_1 = arith.constant 0 : i32
    return %arg0, %c0_i32, %c0_i32_0 : i32, i32, i32
  }
  func.func @transform_4(%arg0: i32) -> (i32, i32, i32) {
    %c0_i32 = arith.constant 0 : i32
    %c0_i32_0 = arith.constant 0 : i32
    %c0_i32_1 = arith.constant 0 : i32
    return %arg0, %c0_i32, %c0_i32_0 : i32, i32, i32
  }
  func.func @transform_5(%arg0: i32) -> (i32, i32, i32) {
    %c0_i32 = arith.constant 0 : i32
    %c0_i32_0 = arith.constant 0 : i32
    %c0_i32_1 = arith.constant 0 : i32
    return %arg0, %c0_i32, %c0_i32_0 : i32, i32, i32
  }
  func.func @transform_6(%arg0: i32) -> (i32, i32, i32) {
    %c0_i32 = arith.constant 0 : i32
    %c0_i32_0 = arith.constant 0 : i32
    %c0_i32_1 = arith.constant 0 : i32
    return %arg0, %c0_i32, %c0_i32_0 : i32, i32, i32
  }
}

</mosaic_0001>

<bundles_post_ra>
// kernel: tpu_custom_call.1
= control target key start
LH: loop header
LB: loop body
LE: loop exit
PB: predicated region body
PF: predicated region fallthrough
CT: control target
= control target key end

     0   :  { %s2360_s0 = inlined_call_operand.hbm [shape: bf16[8,128], index: 0, kind: input, shape index: {}]   ;;  %s2361_s1 = inlined_call_operand.hbm [shape: bf16[2,8,128], index: 1, kind: input, shape index: {}]   ;;  %s2362_s2 = inlined_call_operand.hbm [shape: f32[2,8,128], index: 2, kind: input, shape index: {}]   ;;  %s2363_s3 = inlined_call_operand.hbm [shape: bf16[2,256,512], index: 3, kind: input, shape index: {}]   ;;  %s2364_s4 = inlined_call_operand.hbm [shape: f32[2,1,512], index: 4, kind: input, shape index: {}]   ;;  %s2365_s5 = inlined_call_operand.hbm [shape: f32[2,8,128], index: 5, kind: output, shape index: {0}]   ;;  %s2366_s6 = inlined_call_operand.hbm [shape: f32[2,8,128], index: 6, kind: output, shape index: {1}]  }
   0x1   :  { %2373 = sst [smem:[#allocation24_spill]] %s2360_s0 }
   0x2   :  { %2374 = sst [smem:[#allocation25_spill]] %s2361_s1 }
   0x3   :  { %2375 = sst [smem:[#allocation26_spill]] %s2363_s3 }
   0x4   :  { %12 = vsyncpa [#allocation4], 0 }
   0x5   :  { %13 = vsyncpa [#allocation7], 0 }
   0x6   :  { %15 = vsyncpa [#allocation7 + $0x1], 0 }
   0x7   :  { %16 = vsyncpa [#allocation10], 0 }
   0x8   :  { %18 = vsyncpa [#allocation10 + $0x1], 0 }
   0x9   :  { %19 = vsyncpa [#allocation5], 0 }
   0xa   :  { %21 = vsyncpa [#allocation5 + $0x1], 0 }
   0xb   :  { %22 = vsyncpa [#allocation14], 0 }
   0xc   :  { %24 = vsyncpa [#allocation14 + $0x1], 0  ;;  %s1953_s21 = smov 0   ;;  %s1955_s22 = smov 0  }
   0xd   :  { %s1957_s23 = smov 0   ;;  %s1959_s24 = smov 0  }
   0xe LB: > { %2376 = sst [smem:[#allocation20_spill]] %s1909_s23  ;;  %s1974_s25 = sadd.s32 1, %s1913_s24   ;;  %s1913_s24 = sphi %s1959_s24, %s2393_s24   ;;  %s1909_s23 = sphi %s1957_s23, %s2395_s23   ;;  %s1905_s22 = sphi %s1955_s22, %s2397_s22   ;;  %s1901_s21 = sphi %s1953_s21, %s2396_s21  }
   0xf   : > { %2377 = sst [smem:[#allocation21_spill]] %s1913_s24  ;;  %s58_s26 = sadd.s32 1, %s1909_s23 }
  0x10   : > { %2378 = sst [smem:[#allocation22_spill]] %s1974_s25  ;;  %s55_s27 = ssub.s32 %s1913_s24, %s1974_s25 }
  0x11   : > { %p65_p0 = scmp.ne.s32.totalorder %s1909_s23, %s1905_s22  ;;  %p56_p1 = scmp.eq.s32.totalorder %s55_s27, 0 }
  0x12   : > { %p66_p2 = scmp.eq.s32.totalorder %s1913_s24, 0  ;;  %p1603_p4 = scmp.lt.s32.totalorder %s1913_s24, 2 }
  0x13   : > { %s1985_s28 = scalar_select %p56_p1, %s1909_s23, %s58_s26  }
  0x14   : > { %p67_p5 = por %p66_p2, %p65_p0  ;;  %s2368_s29 = sand.u32 1, %s1913_s24  }
  0x15   : > { %2379 = sst [smem:[#allocation23_spill]] %s1985_s28  ;;  %s1992_s30 = sand.u32 1, %s1909_s23  }
  0x16   : > { %s2367_s7 = sshll.u32 %s1992_s30, 2  ;;  %s1214_s8 = sshll.u32 %s1913_s24, 2 }
  0x17   : > { %s2380_s1 = sld [smem:[#allocation25_spill]]  ;;  %s241_s13 = scalar_lea.vmem [#allocation6], %s2367_s7 }
  0x18   : > { %s249_s14 = sshll.u32 %s241_s13, 4  ;;  %p2003_p6 = pnand %p1603_p4, %p67_p5  ;;  %s250_s14 = int_to_ptr.vmem [resolvable:$true] %s249_s14 }
  0x19   : > { %s2010_s18 = scalar_lea.hbm %s2364_s4, %s1214_s8  ;;  %s1217_s19 = sshll.u32 %s1992_s30, 9 }
  0x1a   : > { %s2015_s20 = scalar_lea.sflag [#allocation7], %s2368_s29  ;;  %p1661_p8 = pneg %p2003_p6 }
  0x1d   : > { %s245_s11 = scalar_lea.hbm %s2380_s1, %s1214_s8 }
  0x1e   : > { %s247_s12 = sshll.u32 %s245_s11, 4  ;;  %s1664_s11 = scalar_lea.hbm %s2380_s1, 8  ;;  %s248_s12 = int_to_ptr.hbm [resolvable:$true] %s247_s12 }
  0x1f   : > { %s1657_s26 = sshra.s32 %s248_s12, 4  ;;  %s1658_s26 = int_to_ptr.hbm [resolvable:$true] %s1657_s26 }
  0x20   : > { %s1659_s27 = scalar_lea.hbm %s1658_s26, 4  ;;  %p1665_p11 = scmp.lt.s32.totalorder %s1658_s26, %s2380_s1 }
  0x21   : > { %p1660_p7 = scmp.ne.s32.totalorder %s1658_s26, %s1659_s27  ;;  %p1666_p12 = scmp.lt.s32.totalorder %s1664_s11, %s1659_s27 }
  0x23   : > { %p1662_p9 = pnand %p1661_p8, %p1660_p7  ;;  %p1667_p13 = por %p1666_p12, %p1665_p11 }
  0x25   : > { %p1663_p10 = pneg %p1662_p9 }
  0x27   : > { %p1668_p1 = pnand %p1667_p13, %p1663_p10 }
  0x29   : > { %1671 = shalt.err (!%p1668_p1)
}
  0x2a   : > { %1585 = dma.hbm_to_vmem [thread:$0]  (!%p2003_p6), %s248_s12, 64, %s250_s14, %s2015_s20  }
  0x2b   : > { %s1497_s16 = sshll.u32 %s1913_s24, 9  ;;  %s2382_s3 = sld [smem:[#allocation26_spill]] }
  0x2c   : > { %s279_s10 = scalar_lea.vmem [#allocation9], %s1217_s19  ;;  %s2383_s26 = sand.u32 1, %s1913_s24  }
  0x2d   : > { %s287_s29 = sshll.u32 %s279_s10, 4  ;;  %s2037_s27 = scalar_lea.sflag [#allocation10], %s2383_s26  ;;  %s288_s29 = int_to_ptr.vmem [resolvable:$true] %s287_s29 }
  0x31   : > { %s284_s9 = scalar_lea.hbm %s2382_s3, %s1497_s16  ;;  %s1694_s7 = scalar_lea.hbm %s2382_s3, 1024 }
  0x32   : > { %s285_s8 = sshll.u32 %s284_s9, 4  ;;  %s286_s8 = int_to_ptr.hbm [resolvable:$true] %s285_s8 }
  0x33   : > { %s1687_s11 = sshra.s32 %s286_s8, 4  ;;  %s1688_s11 = int_to_ptr.hbm [resolvable:$true] %s1687_s11 }
  0x34   : > { %s1689_s13 = scalar_lea.hbm %s1688_s11, 512  ;;  %p1695_p7 = scmp.lt.s32.totalorder %s1688_s11, %s2382_s3 }
  0x35   : > { %p1690_p2 = scmp.ne.s32.totalorder %s1688_s11, %s1689_s13  ;;  %p1696_p9 = scmp.lt.s32.totalorder %s1694_s7, %s1689_s13 }
  0x37   : > { %p1692_p4 = pnand %p1690_p2, %p1661_p8  ;;  %p1697_p10 = por %p1696_p9, %p1695_p7 }
  0x39   : > { %p1693_p5 = pneg %p1692_p4 }
  0x3b   : > { %p1698_p11 = pnand %p1697_p10, %p1693_p5 }
  0x3d   : > { %1701 = shalt.err (!%p1698_p11)
}
  0x3e   : > { %s1915_s17 = smov 256   ;;  %s1916_s9 = smov 16  }
  0x3f   : > { %1591 = dma.hbm_to_vmem [thread:$0]  (!%p2003_p6), %s286_s8, 8192, %s288_s29, %s2037_s27, %s1915_s17, %s1915_s17, %s1916_s9  }
  0x40   : > { %s2052_s10 = sadd.s32 4294967295, %s1913_s24   ;;  %s1209_s26 = sadd.s32 4294967294, %s1913_s24  }
  0x41   : > { %p71_p12 = scmp.ne.s32.totalorder %s1905_s22, %s1901_s21  ;;  %p72_p13 = scmp.eq.s32.totalorder %s2052_s10, 0 }
  0x42   : > { %p173_p1 = scmp.eq.s32.totalorder %s2052_s10, 1  ;;  %p179_p2 = scmp.eq.s32.totalorder %s1209_s26, 1 }
  0x43   : > { %p1210_p4 = scmp.ge.s32.totalorder %s1913_s24, 1  ;;  %p2062_p5 = por %p72_p13, %p71_p12 }
  0x44   : > { %p2069_p7 = por %p173_p1, %p65_p0  ;;  %p2073_p9 = por %p179_p2, %p71_p12 }
  0x45   : > { %p212_p10 = scmp.lt.s32.totalorder %s1913_s24, 3  ;;  %s2387_s0 = sld [smem:[#allocation24_spill]] }
  0x46   : > { %s1215_s19 = sshll.u32 %s1992_s30, 3  ;;  %s1917_s16 = smov [#allocation3]  }
  0x47   : > { %p2082_p3 = pnand %p1210_p4, %p212_p10  ;;  %s226_s17 = sshll.u32 %s1917_s16, 4  ;;  %s227_s17 = int_to_ptr.vmem [resolvable:$true] %s226_s17 }
  0x48   : > { %s1216_s9 = sshll.u32 %s1913_s24, 3  ;;  %s260_s12 = scalar_lea.vmem [#allocation8], %s1215_s19 }
  0x49   : > { %p1578_p0 = pneg %p2082_p3  ;;  %s264_s13 = scalar_lea.hbm %s2362_s2, %s1216_s9 }
  0x4a   : > { %s266_s3 = sshll.u32 %s264_s13, 4  ;;  %s1754_s24 = scalar_lea.hbm %s2362_s2, 16  ;;  %s267_s3 = int_to_ptr.hbm [resolvable:$true] %s266_s3 }
  0x4b   : > { %s224_s14 = sshll.u32 %s2387_s0, 4  ;;  %p1579_p12 = pnand %p1578_p0, %p72_p13  ;;  %s225_s14 = int_to_ptr.hbm [resolvable:$true] %s224_s14 }
  0x4c   : > { %s268_s0 = sshll.u32 %s260_s12, 4  ;;  %s1747_s28 = sshra.s32 %s267_s3, 4  ;;  %s269_s0 = int_to_ptr.vmem [resolvable:$true] %s268_s0  ;;  %s1748_s28 = int_to_ptr.hbm [resolvable:$true] %s1747_s28 }
  0x4d   : > { %1581 = dma.hbm_to_vmem [thread:$0]  (!%p1579_p12), %s225_s14, 64, %s227_s17, [#allocation4]  }
  0x4e   : > { %s1749_s23 = scalar_lea.hbm %s1748_s28, 8  ;;  %p1755_p10 = scmp.lt.s32.totalorder %s1748_s28, %s2362_s2 }
  0x4f   : > { %p1750_p1 = scmp.ne.s32.totalorder %s1748_s28, %s1749_s23  ;;  %p1756_p0 = scmp.lt.s32.totalorder %s1754_s24, %s1749_s23 }
  0x51   : > { %p1752_p2 = pnand %p1750_p1, %p1661_p8  ;;  %p1757_p12 = por %p1756_p0, %p1755_p10 }
  0x53   : > { %p1753_p4 = pneg %p1752_p2 }
  0x55   : > { %p1758_p11 = pnand %p1757_p12, %p1753_p4 }
  0x57   : > { %1761 = shalt.err (!%p1758_p11)
}
  0x58   : > { %1588 = dma.hbm_to_vmem [thread:$0]  (!%p2003_p6), %s267_s3, 128, %s269_s0, %s2015_s20  }
  0x59   : > { %s307_s14 = sshll.u32 %s2010_s18, 4  ;;  %s2389_s19 = sshll.u32 %s1992_s30, 2  ;;  %s308_s14 = int_to_ptr.hbm [resolvable:$true] %s307_s14 }
  0x5a   : > { %s301_s17 = scalar_lea.vmem [#allocation11], %s2389_s19  ;;  %s1777_s26 = sshra.s32 %s308_s14, 4  ;;  %s1778_s26 = int_to_ptr.hbm [resolvable:$true] %s1777_s26 }
  0x5b   : > { %s309_s25 = sshll.u32 %s301_s17, 4  ;;  %s1779_s28 = scalar_lea.hbm %s1778_s26, 4  ;;  %s310_s25 = int_to_ptr.vmem [resolvable:$true] %s309_s25 }
  0x5c   : > { %p1780_p1 = scmp.ne.s32.totalorder %s1778_s26, %s1779_s28  ;;  %s1784_s13 = scalar_lea.hbm %s2364_s4, 8 }
  0x5d   : > { %p1785_p4 = scmp.lt.s32.totalorder %s1778_s26, %s2364_s4  ;;  %p1786_p10 = scmp.lt.s32.totalorder %s1784_s13, %s1779_s28 }
  0x5e   : > { %p1782_p11 = pnand %p1780_p1, %p1661_p8 }
  0x5f   : > { %p1787_p0 = por %p1786_p10, %p1785_p4 }
  0x60   : > { %p1783_p2 = pneg %p1782_p11 }
  0x62   : > { %p1788_p12 = pnand %p1787_p0, %p1783_p2 }
  0x64   : > { %1791 = shalt.err (!%p1788_p12)
}
  0x65   : > { %1594 = dma.hbm_to_vmem [thread:$0]  (!%p2003_p6), %s308_s14, 64, %s310_s25, %s2037_s27  }
  0x66   : > { %318 = sbr.rel (%p2082_p3) target bundleno = 392 (0x188), region = 40 }
  0x6b   : > { %1880 = dma.done.wait (%p72_p13), [#allocation4], 64  }
  0x6c   : > { %1882 = vsyncadd (%p72_p13), [#allocation4], 4294967232  ;;  %s325_s3 = sand.u32 1, %s2052_s10   ;;  %s2130_s30 = sand.u32 1, %s1905_s22  }
  0x6d   : > { %s1224_s18 = sshll.u32 %s2130_s30, 2  ;;  %s326_s15 = scalar_lea.sflag [#allocation7], %s325_s3 }
  0x6e   : > { %s2133_s20 = scalar_lea.vmem [#allocation6], %s1224_s18 }
  0x6f   : > { %1884 = dma.done.wait (%p2062_p5), %s326_s15, 192  }
  0x70   : > { %1886 = vsyncadd (%p2062_p5), %s326_s15, 4294967104  ;;  %s2140_s27 = sshll.u32 %s2130_s30, 3  ;;  %s1226_s7 = sshll.u32 %s2130_s30, 9 }
  0x71   : > { %s339_s16 = scalar_lea.vmem [#allocation8], %s2140_s27  ;;  %s346_s1 = scalar_lea.sflag [#allocation10], %s325_s3 }
  0x72   : > { %s2144_s9 = scalar_lea.vmem [#allocation9], %s1226_s7 }
  0x73   : > { %1888 = dma.done.wait (%p2062_p5), %s346_s1, 8256  }
  0x74   : > { %1890 = vsyncadd (%p2062_p5), %s346_s1, 4294959040  ;;  %s2150_s14 = scalar_lea.vmem [#allocation11], %s1224_s18  ;;  %s401_s19 = scalar_lea.vmem [#allocation12], %s2140_s27 }
  0x75   : > { %s408_s17 = scalar_lea.vmem [#allocation13], %s2140_s27  ;;  %p2390_p3 = scmp.ne.s32.totalorder %s2052_s10, 0 }
  0x77   : > { %412 = sbr.rel (%p2390_p3) target bundleno = 126 (0x7e), region = 64 }
  0x7c   : > { %v413_v0 = vld [vmem:[#allocation3] sm:$0xf] }
  0x7d   : > { %414 = vst [vmem:[#allocation2] sm:$0xf] %v413_v0 }
  0x7e PF: > { %v1345_v1 = vld [vmem:[%s2144_s9 + $0xe0] sm:$0xf]  ;;  %v1528_v2 = vld [vmem:[%s2144_s9 + $0xec] sm:$0xf0]  ;;  %v1526_v3 = vld [vmem:[%s2144_s9 + $0xe4] sm:$0xf] }
  0x7f   : > { %v1346_v4 = vor.u32 %v1528_v2, %v1345_v1  ;;  %v1347_v5 = vld [vmem:[%s2144_s9 + $0xf0] sm:$0xf0]  ;;  %v1558_v6 = vld [vmem:[%s2144_s9 + $0x1e4] sm:$0xf]  ;;  %v1473_v10 = vld [vmem:[%s2144_s9 + $0x1e0] sm:$0xf] }
  0x80   : > { %v1475_v7 = vld [vmem:[%s2144_s9 + $0x1f0] sm:$0xf0]  ;;  %v1350_v8 = vor.u32 %v1526_v3, %v1347_v5  ;;  %v1560_v11 = vld [vmem:[%s2144_s9 + $0x1ec] sm:$0xf0]  ;;  %v1329_v12 = vld [vmem:[%s2144_s9 + $0xc0] sm:$0xf] }
  0x81   : > { %v1478_v9 = vor.u32 %v1558_v6, %v1475_v7  ;;  %819 = vmatpush.bf16.msra.mxu0 %v1346_v4  ;;  %v1474_v13 = vor.u32 %v1560_v11, %v1473_v10  ;;  %v1524_v14 = vld [vmem:[%s2144_s9 + $0xcc] sm:$0xf0]  ;;  %v1522_v15 = vld [vmem:[%s2144_s9 + $0xc4] sm:$0xf]  ;;  %v1331_v16 = vld [vmem:[%s2144_s9 + $0xd0] sm:$0xf0] }
  0x82   : > { %845 = vmatpush.bf16.msra.mxu2 %v1350_v8  ;;  %v1330_v17 = vor.u32 %v1524_v14, %v1329_v12  ;;  %v1334_v18 = vor.u32 %v1522_v15, %v1331_v16  ;;  %v1554_v19 = vld [vmem:[%s2144_s9 + $0x1c4] sm:$0xf]  ;;  %v1459_v20 = vld [vmem:[%s2144_s9 + $0x1d0] sm:$0xf0]  ;;  %v1457_v21 = vld [vmem:[%s2144_s9 + $0x1c0] sm:$0xf] }
  0x83   : > { %858 = vmatpush.bf16.msra.mxu3 %v1478_v9  ;;  %832 = vmatpush.bf16.msra.mxu1 %v1474_v13  ;;  %v1462_v22 = vor.u32 %v1554_v19, %v1459_v20  ;;  %v1556_v23 = vld [vmem:[%s2144_s9 + $0x1cc] sm:$0xf0]  ;;  %v1313_v24 = vld [vmem:[%s2144_s9 + $0xa0] sm:$0xf]  ;;  %v1518_v27 = vld [vmem:[%s2144_s9 + $0xa4] sm:$0xf] }
  0x84   : > { %v1520_v25 = vld [vmem:[%s2144_s9 + $0xac] sm:$0xf0]  ;;  %v1458_v26 = vor.u32 %v1556_v23, %v1457_v21  ;;  %v1315_v28 = vld [vmem:[%s2144_s9 + $0xb0] sm:$0xf0]  ;;  %v1550_v29 = vld [vmem:[%s2144_s9 + $0x1a4] sm:$0xf] }
  0x85   : > { %820 = vmatpush.bf16.msra.mxu0 %v1330_v17  ;;  %v1314_v30 = vor.u32 %v1520_v25, %v1313_v24  ;;  %v1443_v31 = vld [vmem:[%s2144_s9 + $0x1b0] sm:$0xf0]  ;;  %v1441_v32 = vld [vmem:[%s2144_s9 + $0x1a0] sm:$0xf]  ;;  %v1552_v33 = vld [vmem:[%s2144_s9 + $0x1ac] sm:$0xf0]  ;;  %v1318_v34 = vor.u32 %v1518_v27, %v1315_v28 }
  0x86   : > { %846 = vmatpush.bf16.msra.mxu2 %v1334_v18  ;;  %v1446_v35 = vor.u32 %v1550_v29, %v1443_v31  ;;  %v1297_v36 = vld [vmem:[%s2144_s9 + $0x80] sm:$0xf]  ;;  %v1516_v37 = vld [vmem:[%s2144_s9 + $0x8c] sm:$0xf0]  ;;  %v1514_v38 = vld [vmem:[%s2144_s9 + $0x84] sm:$0xf]  ;;  %v1442_v39 = vor.u32 %v1552_v33, %v1441_v32 }
  0x87   : > { %859 = vmatpush.bf16.msra.mxu3 %v1462_v22  ;;  %833 = vmatpush.bf16.msra.mxu1 %v1458_v26  ;;  %v1299_v40 = vld [vmem:[%s2144_s9 + $0x90] sm:$0xf0]  ;;  %v1546_v41 = vld [vmem:[%s2144_s9 + $0x184] sm:$0xf]  ;;  %v1425_v43 = vld [vmem:[%s2144_s9 + $0x180] sm:$0xf]  ;;  %v1298_v45 = vor.u32 %v1516_v37, %v1297_v36 }
  0x88   : > { %v1427_v42 = vld [vmem:[%s2144_s9 + $0x190] sm:$0xf0]  ;;  %v1548_v44 = vld [vmem:[%s2144_s9 + $0x18c] sm:$0xf0]  ;;  %v1302_v46 = vor.u32 %v1514_v38, %v1299_v40  ;;  %v1281_v48 = vld [vmem:[%s2144_s9 + $0x60] sm:$0xf] }
  0x89   : > { %821 = vmatpush.bf16.msra.mxu0 %v1314_v30  ;;  %v1430_v47 = vor.u32 %v1546_v41, %v1427_v42  ;;  %v1512_v49 = vld [vmem:[%s2144_s9 + $0x6c] sm:$0xf0]  ;;  %v1510_v50 = vld [vmem:[%s2144_s9 + $0x64] sm:$0xf]  ;;  %v1426_v51 = vor.u32 %v1548_v44, %v1425_v43  ;;  %v1283_v52 = vld [vmem:[%s2144_s9 + $0x70] sm:$0xf0] }
  0x8a   : > { %847 = vmatpush.bf16.msra.mxu2 %v1318_v34  ;;  %v1542_v53 = vld [vmem:[%s2144_s9 + $0x164] sm:$0xf]  ;;  %v1411_v54 = vld [vmem:[%s2144_s9 + $0x170] sm:$0xf0]  ;;  %v1409_v55 = vld [vmem:[%s2144_s9 + $0x160] sm:$0xf]  ;;  %v1282_v57 = vor.u32 %v1512_v49, %v1281_v48  ;;  %v1286_v58 = vor.u32 %v1510_v50, %v1283_v52 }
  0x8b   : > { %860 = vmatpush.bf16.msra.mxu3 %v1446_v35  ;;  %834 = vmatpush.bf16.msra.mxu1 %v1442_v39  ;;  %v1544_v56 = vld [vmem:[%s2144_s9 + $0x16c] sm:$0xf0]  ;;  %v1414_v59 = vor.u32 %v1542_v53, %v1411_v54  ;;  %v1265_v60 = vld [vmem:[%s2144_s9 + $0x40] sm:$0xf]  ;;  %v1506_v62 = vld [vmem:[%s2144_s9 + $0x44] sm:$0xf] }
  0x8c   : > { %v1508_v61 = vld [vmem:[%s2144_s9 + $0x4c] sm:$0xf0]  ;;  %v1410_v63 = vor.u32 %v1544_v56, %v1409_v55  ;;  %v1267_v0 = vld [vmem:[%s2144_s9 + $0x50] sm:$0xf0]  ;;  %v1538_v1 = vld [vmem:[%s2144_s9 + $0x144] sm:$0xf] }
  0x8d   : > { %822 = vmatpush.bf16.msra.mxu0 %v1298_v45  ;;  %v1395_v2 = vld [vmem:[%s2144_s9 + $0x150] sm:$0xf0]  ;;  %v1393_v3 = vld [vmem:[%s2144_s9 + $0x140] sm:$0xf]  ;;  %v1540_v4 = vld [vmem:[%s2144_s9 + $0x14c] sm:$0xf0]  ;;  %v1266_v5 = vor.u32 %v1508_v61, %v1265_v60  ;;  %v1270_v6 = vor.u32 %v1506_v62, %v1267_v0 }
  0x8e   : > { %848 = vmatpush.bf16.msra.mxu2 %v1302_v46  ;;  %v1398_v7 = vor.u32 %v1538_v1, %v1395_v2  ;;  %v1249_v8 = vld [vmem:[%s2144_s9 + $0x20] sm:$0xf]  ;;  %v1504_v9 = vld [vmem:[%s2144_s9 + $0x2c] sm:$0xf0]  ;;  %v1502_v10 = vld [vmem:[%s2144_s9 + $0x24] sm:$0xf]  ;;  %v1394_v11 = vor.u32 %v1540_v4, %v1393_v3 }
  0x8f   : > { %861 = vmatpush.bf16.msra.mxu3 %v1430_v47  ;;  %835 = vmatpush.bf16.msra.mxu1 %v1426_v51  ;;  %v1251_v12 = vld [vmem:[%s2144_s9 + $0x30] sm:$0xf0]  ;;  %v1534_v13 = vld [vmem:[%s2144_s9 + $0x124] sm:$0xf]  ;;  %v1377_v15 = vld [vmem:[%s2144_s9 + $0x120] sm:$0xf]  ;;  %v1250_v18 = vor.u32 %v1504_v9, %v1249_v8 }
  0x90   : > { %v1379_v14 = vld [vmem:[%s2144_s9 + $0x130] sm:$0xf0]  ;;  %v1536_v16 = vld [vmem:[%s2144_s9 + $0x12c] sm:$0xf0]  ;;  %v1233_v17 = vld [vmem:[%s2144_s9] sm:$0xf]  ;;  %v1254_v22 = vor.u32 %v1502_v10, %v1251_v12 }
  0x91   : > { %823 = vmatpush.bf16.msra.mxu0 %v1282_v57  ;;  %v1500_v19 = vld [vmem:[%s2144_s9 + $0xc] sm:$0xf0]  ;;  %v1498_v20 = vld [vmem:[%s2144_s9 + $0x4] sm:$0xf]  ;;  %v415_v21 = vld [vmem:[%s2133_s20] sm:$0xf]  ;;  %v1382_v23 = vor.u32 %v1534_v13, %v1379_v14  ;;  %v1378_v26 = vor.u32 %v1536_v16, %v1377_v15 }
  0x92   : > { %849 = vmatpush.bf16.msra.mxu2 %v1286_v58  ;;  %v1235_v24 = vld [vmem:[%s2144_s9 + $0x10] sm:$0xf0]  ;;  %v1530_v25 = vld [vmem:[%s2144_s9 + $0x104] sm:$0xf]  ;;  %416 = vst [vmem:[#allocation2 + $0x4] sm:$0xf] %v415_v21  ;;  %v1234_v33 = vor.u32 %v1500_v19, %v1233_v17 }
  0x93   : > { %862 = vmatpush.bf16.msra.mxu3 %v1414_v59  ;;  %836 = vmatpush.bf16.msra.mxu1 %v1410_v63  ;;  %v1363_v27 = vld [vmem:[%s2144_s9 + $0x110] sm:$0xf0]  ;;  %v1353_v28 = vld [vmem:[%s2144_s9 + $0xe8] sm:$0xf]  ;;  %v1529_v29 = vld [vmem:[%s2144_s9 + $0xf4] sm:$0xf0]  ;;  %v1238_v37 = vor.u32 %v1498_v20, %v1235_v24 }
  0x94   : > { %v1527_v30 = vld [vmem:[%s2144_s9 + $0xec] sm:$0xf]  ;;  %v1355_v31 = vld [vmem:[%s2144_s9 + $0xf8] sm:$0xf0]  ;;  %v1361_v35 = vld [vmem:[%s2144_s9 + $0x100] sm:$0xf]  ;;  %v1366_v38 = vor.u32 %v1530_v25, %v1363_v27  ;;  %v1354_v41 = vor.u32 %v1529_v29, %v1353_v28 }
  0x95   : > { %824 = vmatpush.bf16.msra.mxu0 %v1266_v5  ;;  %v1559_v32 = vld [vmem:[%s2144_s9 + $0x1ec] sm:$0xf]  ;;  %v1483_v34 = vld [vmem:[%s2144_s9 + $0x1f8] sm:$0xf0]  ;;  %v1532_v36 = vld [vmem:[%s2144_s9 + $0x10c] sm:$0xf0]  ;;  %v1358_v42 = vor.u32 %v1527_v30, %v1355_v31 }
  0x96   : > { %850 = vmatpush.bf16.msra.mxu2 %v1270_v6  ;;  %v1481_v39 = vld [vmem:[%s2144_s9 + $0x1e8] sm:$0xf]  ;;  %v1561_v40 = vld [vmem:[%s2144_s9 + $0x1f4] sm:$0xf0]  ;;  %v1486_v44 = vor.u32 %v1559_v32, %v1483_v34  ;;  %v1362_v45 = vor.u32 %v1532_v36, %v1361_v35  ;;  %v1523_v47 = vld [vmem:[%s2144_s9 + $0xcc] sm:$0xf] }
  0x97   : > { %863 = vmatpush.bf16.msra.mxu3 %v1398_v7  ;;  %837 = vmatpush.bf16.msra.mxu1 %v1394_v11  ;;  %v1337_v43 = vld [vmem:[%s2144_s9 + $0xc8] sm:$0xf]  ;;  %v1525_v46 = vld [vmem:[%s2144_s9 + $0xd4] sm:$0xf0]  ;;  %v1339_v48 = vld [vmem:[%s2144_s9 + $0xd8] sm:$0xf0]  ;;  %v1482_v50 = vor.u32 %v1561_v40, %v1481_v39 }
  0x98   : > { %v1555_v51 = vld [vmem:[%s2144_s9 + $0x1cc] sm:$0xf]  ;;  %v1467_v52 = vld [vmem:[%s2144_s9 + $0x1d8] sm:$0xf0]  ;;  %v1465_v55 = vld [vmem:[%s2144_s9 + $0x1c8] sm:$0xf]  ;;  %v1338_v57 = vor.u32 %v1525_v46, %v1337_v43  ;;  %v1342_v58 = vor.u32 %v1523_v47, %v1339_v48 }
  0x99   : > { %825 = vmatpush.bf16.msra.mxu0 %v1250_v18  ;;  %v417_v49 = vld [vmem:[#allocation2] sm:$0xff]  ;;  %v1557_v56 = vld [vmem:[%s2144_s9 + $0x1d4] sm:$0xf0]  ;;  %v1321_v59 = vld [vmem:[%s2144_s9 + $0xa8] sm:$0xf]  ;;  %v1470_v62 = vor.u32 %v1555_v51, %v1467_v52  ;;  %s989_s11 = sadd.s32 1, %s2052_s10 }
  0x9a   : > { %851 = vmatpush.bf16.msra.mxu2 %v1254_v22  ;;  %v493_v53 = vunpack.c.l.b16 %v417_v49  ;;  %v494_v54 = vunpack.c.h.b16 %v417_v49  ;;  %v1521_v63 = vld [vmem:[%s2144_s9 + $0xb4] sm:$0xf0]  ;;  %v1519_v0 = vld [vmem:[%s2144_s9 + $0xac] sm:$0xf]  ;;  %v1323_v1 = vld [vmem:[%s2144_s9 + $0xb8] sm:$0xf0]  ;;  %v1466_v2 = vor.u32 %v1557_v56, %v1465_v55 }
  0x9b   : > { %864 = vmatpush.bf16.msra.mxu3 %v1382_v23  ;;  %838 = vmatpush.bf16.msra.mxu1 %v1378_v26  ;;  %v1551_v3 = vld [vmem:[%s2144_s9 + $0x1ac] sm:$0xf]  ;;  %v1451_v4 = vld [vmem:[%s2144_s9 + $0x1b8] sm:$0xf0]  ;;  %v1449_v5 = vld [vmem:[%s2144_s9 + $0x1a8] sm:$0xf]  ;;  %v1322_v7 = vor.u32 %v1521_v63, %v1321_v59  ;;  %v1326_v8 = vor.u32 %v1519_v0, %v1323_v1 }
  0x9c   : > { %v2238_v60 = vpack.c.b16 %v493_v53, %v493_v53  ;;  %v2240_v61 = vpack.c.b16 %v494_v54, %v494_v54  ;;  %v1553_v6 = vld [vmem:[%s2144_s9 + $0x1b4] sm:$0xf0]  ;;  %v1305_v9 = vld [vmem:[%s2144_s9 + $0x88] sm:$0xf]  ;;  %v1454_v10 = vor.u32 %v1551_v3, %v1451_v4  ;;  %v1515_v12 = vld [vmem:[%s2144_s9 + $0x8c] sm:$0xf] }
  0x9d   : > { %826 = vmatpush.bf16.msra.mxu0 %v1234_v33  ;;  %v1517_v11 = vld [vmem:[%s2144_s9 + $0x94] sm:$0xf0]  ;;  %v1307_v13 = vld [vmem:[%s2144_s9 + $0x98] sm:$0xf0]  ;;  %v1450_v14 = vor.u32 %v1553_v6, %v1449_v5  ;;  %v1547_v15 = vld [vmem:[%s2144_s9 + $0x18c] sm:$0xf] }
  0x9e   : > { %852 = vmatpush.bf16.msra.mxu2 %v1238_v37  ;;  %v1435_v16 = vld [vmem:[%s2144_s9 + $0x198] sm:$0xf0]  ;;  %v1433_v17 = vld [vmem:[%s2144_s9 + $0x188] sm:$0xf]  ;;  %v1549_v18 = vld [vmem:[%s2144_s9 + $0x194] sm:$0xf0]  ;;  %v1306_v19 = vor.u32 %v1517_v11, %v1305_v9  ;;  %v1310_v20 = vor.u32 %v1515_v12, %v1307_v13 }
  0x9f   : > { %865 = vmatpush.bf16.msra.mxu3 %v1366_v38  ;;  %839 = vmatpush.bf16.msra.mxu1 %v1362_v45  ;;  %v1289_v21 = vld [vmem:[%s2144_s9 + $0x68] sm:$0xf]  ;;  %v1438_v22 = vor.u32 %v1547_v15, %v1435_v16  ;;  %v1513_v23 = vld [vmem:[%s2144_s9 + $0x74] sm:$0xf0]  ;;  %v1511_v24 = vld [vmem:[%s2144_s9 + $0x6c] sm:$0xf]  ;;  %v1434_v26 = vor.u32 %v1549_v18, %v1433_v17 }
  0xa0   : > { %827 = vmatmul.bf16.vlgmr.msra.gmra.mxu0 %v2238_v60  ;;  %v1291_v25 = vld [vmem:[%s2144_s9 + $0x78] sm:$0xf0]  ;;  %v1543_v27 = vld [vmem:[%s2144_s9 + $0x16c] sm:$0xf]  ;;  %v1417_v29 = vld [vmem:[%s2144_s9 + $0x168] sm:$0xf]  ;;  %v1290_v31 = vor.u32 %v1513_v23, %v1289_v21 }
  0xa1   : > { %871 = vmatpush.bf16.msrb.mxu0 %v1354_v41  ;;  %853 = vmatmul.bf16.vlgmr.msra.gmra.mxu2 %v2238_v60  ;;  %v1419_v28 = vld [vmem:[%s2144_s9 + $0x178] sm:$0xf0]  ;;  %v1545_v30 = vld [vmem:[%s2144_s9 + $0x174] sm:$0xf0]  ;;  %v1294_v32 = vor.u32 %v1511_v24, %v1291_v25  ;;  %v1273_v33 = vld [vmem:[%s2144_s9 + $0x48] sm:$0xf] }
  0xa2   : > { %897 = vmatpush.bf16.msrb.mxu2 %v1358_v42  ;;  %866 = vmatmul.bf16.vlgmr.msra.gmra.mxu3 %v2240_v61  ;;  %v1422_v34 = vor.u32 %v1543_v27, %v1419_v28  ;;  %v1509_v35 = vld [vmem:[%s2144_s9 + $0x54] sm:$0xf0]  ;;  %v1507_v36 = vld [vmem:[%s2144_s9 + $0x4c] sm:$0xf]  ;;  %v1275_v37 = vld [vmem:[%s2144_s9 + $0x58] sm:$0xf0]  ;;  %v1418_v38 = vor.u32 %v1545_v30, %v1417_v29 }
  0xa3   : > { %910 = vmatpush.bf16.msrb.mxu3 %v1486_v44  ;;  %884 = vmatpush.bf16.msrb.mxu1 %v1482_v50  ;;  %v1539_v39 = vld [vmem:[%s2144_s9 + $0x14c] sm:$0xf]  ;;  %v1403_v40 = vld [vmem:[%s2144_s9 + $0x158] sm:$0xf0]  ;;  %v1401_v41 = vld [vmem:[%s2144_s9 + $0x148] sm:$0xf]  ;;  %v1274_v43 = vor.u32 %v1509_v35, %v1273_v33  ;;  %v1278_v44 = vor.u32 %v1507_v36, %v1275_v37 }
  0xa4   : > { %840 = vmatmul.bf16.vlgmr.msra.gmra.mxu1 %v2240_v61  ;;  %v1541_v42 = vld [vmem:[%s2144_s9 + $0x154] sm:$0xf0]  ;;  %v1257_v45 = vld [vmem:[%s2144_s9 + $0x28] sm:$0xf]  ;;  %v1406_v46 = vor.u32 %v1539_v39, %v1403_v40  ;;  %v1503_v48 = vld [vmem:[%s2144_s9 + $0x2c] sm:$0xf] }
  0xa5   : > { %872 = vmatpush.bf16.msrb.mxu0 %v1338_v57  ;;  %v1505_v47 = vld [vmem:[%s2144_s9 + $0x34] sm:$0xf0]  ;;  %v1259_v49 = vld [vmem:[%s2144_s9 + $0x38] sm:$0xf0]  ;;  %v1402_v50 = vor.u32 %v1541_v42, %v1401_v41  ;;  %v1535_v51 = vld [vmem:[%s2144_s9 + $0x12c] sm:$0xf] }
  0xa6   : > { %898 = vmatpush.bf16.msrb.mxu2 %v1342_v58  ;;  %v1387_v52 = vld [vmem:[%s2144_s9 + $0x138] sm:$0xf0]  ;;  %v1385_v53 = vld [vmem:[%s2144_s9 + $0x128] sm:$0xf]  ;;  %v1537_v54 = vld [vmem:[%s2144_s9 + $0x134] sm:$0xf0]  ;;  %v1258_v55 = vor.u32 %v1505_v47, %v1257_v45  ;;  %v1262_v56 = vor.u32 %v1503_v48, %v1259_v49 }
  0xa7   : > { %911 = vmatpush.bf16.msrb.mxu3 %v1470_v62  ;;  %885 = vmatpush.bf16.msrb.mxu1 %v1466_v2  ;;  %v1241_v57 = vld [vmem:[%s2144_s9 + $0x8] sm:$0xf]  ;;  %v1390_v58 = vor.u32 %v1535_v51, %v1387_v52  ;;  %v1501_v59 = vld [vmem:[%s2144_s9 + $0x14] sm:$0xf0]  ;;  %v1499_v62 = vld [vmem:[%s2144_s9 + $0xc] sm:$0xf]  ;;  %v1386_v0 = vor.u32 %v1537_v54, %v1385_v53 }
  0xa8   : > { %v1243_v63 = vld [vmem:[%s2144_s9 + $0x18] sm:$0xf0]  ;;  %v1531_v1 = vld [vmem:[%s2144_s9 + $0x10c] sm:$0xf]  ;;  %v1369_v3 = vld [vmem:[%s2144_s9 + $0x108] sm:$0xf]  ;;  %v1242_v5 = vor.u32 %v1501_v59, %v1241_v57 }
  0xa9   : > { %873 = vmatpush.bf16.msrb.mxu0 %v1322_v7  ;;  %v1371_v2 = vld [vmem:[%s2144_s9 + $0x118] sm:$0xf0]  ;;  %v1533_v4 = vld [vmem:[%s2144_s9 + $0x114] sm:$0xf0]  ;;  %v1246_v6 = vor.u32 %v1499_v62, %v1243_v63  ;;  %v482_v9 = vld [vmem:[%s2150_s14] sm:$0xf] }
  0xaa   : > { %899 = vmatpush.bf16.msrb.mxu2 %v1326_v8  ;;  %v1374_v7 = vor.u32 %v1531_v1, %v1371_v2  ;;  %v1370_v8 = vor.u32 %v1533_v4, %v1369_v3  ;;  %v485_v12 = vperm.slane %v482_v9, 1  ;;  %v486_v30 = vperm.slane %v482_v9, 2  ;;  %v981_v57 = vld [vmem:[%s339_s16] sm:$0xff]  ;;  %p1490_p6 = scmp.ge.s32.totalorder %s989_s11, 2 }
  0xab   : > { %912 = vmatpush.bf16.msrb.mxu3 %v1454_v10  ;;  %886 = vmatpush.bf16.msrb.mxu1 %v1450_v14  ;;  %v484_v10 = vperm.slane %v482_v9, 0 }
  0xad   : > { %874 = vmatpush.bf16.msrb.mxu0 %v1306_v19 }
  0xae   : > { %900 = vmatpush.bf16.msrb.mxu2 %v1310_v20 }
  0xaf   : > { %913 = vmatpush.bf16.msrb.mxu3 %v1438_v22  ;;  %887 = vmatpush.bf16.msrb.mxu1 %v1434_v26 }
  0xb1   : > { %875 = vmatpush.bf16.msrb.mxu0 %v1290_v31 }
  0xb2   : > { %901 = vmatpush.bf16.msrb.mxu2 %v1294_v32 }
  0xb3   : > { %914 = vmatpush.bf16.msrb.mxu3 %v1422_v34  ;;  %888 = vmatpush.bf16.msrb.mxu1 %v1418_v38  ;;  %v487_v34 = vperm.slane %v482_v9, 3 }
  0xb5   : > { %876 = vmatpush.bf16.msrb.mxu0 %v1274_v43 }
  0xb6   : > { %902 = vmatpush.bf16.msrb.mxu2 %v1278_v44 }
  0xb7   : > { %915 = vmatpush.bf16.msrb.mxu3 %v1406_v46  ;;  %889 = vmatpush.bf16.msrb.mxu1 %v1402_v50 }
  0xb9   : > { %877 = vmatpush.bf16.msrb.mxu0 %v1258_v55 }
  0xba   : > { %903 = vmatpush.bf16.msrb.mxu2 %v1262_v56 }
  0xbb   : > { %916 = vmatpush.bf16.msrb.mxu3 %v1390_v58  ;;  %890 = vmatpush.bf16.msrb.mxu1 %v1386_v0 }
  0xbd   : > { %878 = vmatpush.bf16.msrb.mxu0 %v1242_v5 }
  0xbe   : > { %904 = vmatpush.bf16.msrb.mxu2 %v1246_v6 }
  0xbf   : > { %917 = vmatpush.bf16.msrb.mxu3 %v1374_v7  ;;  %891 = vmatpush.bf16.msrb.mxu1 %v1370_v8 }
  0xc0   : > { %879 = vmatmul.bf16.vlgmr.msrb.gmra.mxu0 %v2238_v60 }
  0xc1   : > { %905 = vmatmul.bf16.vlgmr.msrb.gmra.mxu2 %v2238_v60 }
  0xc2   : > { %918 = vmatmul.bf16.vlgmr.msrb.gmra.mxu3 %v2240_v61  ;;  %892 = vmatmul.bf16.vlgmr.msrb.gmra.mxu1 %v2240_v61 }
 0x11d   : > { %v828_v11 = vpop.f32.mrf.mxu0 }
 0x11e   : > { %v829_v13 = vadd.f32 %v828_v11, %v484_v10 }
 0x121   : > { %v841_v14 = vpop.f32.mrf.mxu1 }
 0x122   : > { %v842_v15 = vadd.f32 %v841_v14, %v829_v13 }
 0x124   : > { %v854_v16 = vpop.f32.mrf.mxu2  ;;  %v1487_v19 = vmul.f32 -1.442695, %v842_v15 }
 0x125   : > { %v867_v17 = vpop.f32.mrf.mxu3  ;;  %v855_v18 = vadd.f32 %v854_v16, %v485_v12  ;;  %v830_v21 = vpop.f32.mrf.mxu0 }
 0x126   : > { %1641 = vpow2.f32 %v1487_v19 }
 0x127   : > { %v868_v20 = vadd.f32 %v867_v17, %v855_v18 }
 0x129   : > { %v1488_v60 = vmul.f32 -1.442695, %v868_v20  ;;  %v843_v22 = vpop.f32.mrf.mxu1 }
 0x12b   : > { %1643 = vpow2.f32 %v1488_v60 }
 0x12c   : > { %v856_v23 = vpop.f32.mrf.mxu2  ;;  %v1642_v24 = vpop.eup %1641 }
 0x12d   : > { %v869_v61 = vpop.f32.mrf.mxu3  ;;  %v926_v25 = vadd.f32 1.0, %v1642_v24 }
 0x12f   : > { %1645 = vrcp.f32 %v926_v25  ;;  %vm932_vm0 = vweird.f32 %v926_v25  ;;  %v938_v38 = vand.u32 2147483648, %v926_v25  ;;  %v936_v41 = vand.u32 2147483647, %v926_v25 }
 0x131   : > { %v1644_v26 = vpop.eup %1643  ;;  %v939_v47 = vor.u32 1.1754944e-38, %v938_v38  ;;  %vm937_vm6 = vcmp.eq.f32.partialorder %v936_v41, 8.507059e+37 }
 0x132   : > { %v945_v27 = vadd.f32 1.0, %v1644_v26 }
 0x134   : > { %1647 = vrcp.f32 %v945_v27  ;;  %vm951_vm2 = vweird.f32 %v945_v27  ;;  %v957_v39 = vand.u32 2147483648, %v945_v27  ;;  %v955_v42 = vand.u32 2147483647, %v945_v27 }
 0x135   : > { %v1646_v28 = vpop.eup %1645 }
 0x136   : > { %v928_v29 = vmul.f32 %v1646_v28, %v926_v25  ;;  %vm933_vm1 = vweird.f32 %v1646_v28  ;;  %v958_v48 = vor.u32 1.1754944e-38, %v957_v39  ;;  %vm956_vm7 = vcmp.eq.f32.partialorder %v955_v42, 8.507059e+37 }
 0x137   : > { %vm934_vm4 = vmor %vm932_vm0, %vm933_vm1 }
 0x138   : > { %v929_v31 = vsub.f32 1.0, %v928_v29 }
 0x13a   : > { %v1648_v32 = vpop.eup %1647  ;;  %v930_v37 = vmul.f32 %v1646_v28, %v929_v31 }
 0x13b   : > { %v947_v35 = vmul.f32 %v1648_v32, %v945_v27  ;;  %vm952_vm3 = vweird.f32 %v1648_v32 }
 0x13c   : > { %v931_v45 = vadd.f32 %v1646_v28, %v930_v37  ;;  %vm953_vm5 = vmor %vm951_vm2, %vm952_vm3 }
 0x13d   : > { %v880_v33 = vpop.f32.mrf.mxu0  ;;  %v948_v43 = vsub.f32 1.0, %v947_v35 }
 0x13e   : > { %v881_v36 = vadd.f32 %v880_v33, %v486_v30  ;;  %v935_v49 = vsel %vm934_vm4, %v1646_v28, %v931_v45 }
 0x13f   : > { %v893_v40 = vpop.f32.mrf.mxu1  ;;  %v949_v46 = vmul.f32 %v1648_v32, %v948_v43  ;;  %v940_v55 = vsel %vm937_vm6, %v939_v47, %v935_v49 }
 0x140   : > { %v894_v44 = vadd.f32 %v893_v40, %v881_v36 }
 0x141   : > { %v950_v51 = vadd.f32 %v1648_v32, %v949_v46 }
 0x142   : > { %1649 = vtanh.f32 %v894_v44 }
 0x143   : > { %v954_v56 = vsel %vm953_vm5, %v1648_v32, %v950_v51 }
 0x144   : > { %v906_v50 = vpop.f32.mrf.mxu2  ;;  %v959_v59 = vsel %vm956_vm7, %v958_v48, %v954_v56 }
 0x145   : > { %v907_v52 = vadd.f32 %v906_v50, %v487_v34  ;;  %v919_v53 = vpop.f32.mrf.mxu3  ;;  %v882_v54 = vpop.f32.mrf.mxu0  ;;  %v982_v1 = vmul.f32 %v981_v57, %v959_v59 }
 0x147   : > { %v920_v58 = vadd.f32 %v919_v53, %v907_v52  ;;  %v895_v62 = vpop.f32.mrf.mxu1 }
 0x148   : > { %v1650_v63 = vpop.eup %1649 }
 0x149   : > { %v1489_v0 = vmul.f32 -1.442695, %v920_v58  ;;  %v983_v2 = vmul.f32 %v1650_v63, %v940_v55 }
 0x14b   : > { %1651 = vpow2.f32 %v1489_v0  ;;  %v984_v3 = vadd.f32 %v983_v2, %v982_v1 }
 0x14c   : > { %v908_v4 = vpop.f32.mrf.mxu2 }
 0x14d   : > { %v921_v5 = vpop.f32.mrf.mxu3  ;;  %988 = vst [vmem:[%s408_s17] sm:$0xff] %v984_v3 }
 0x151   : > { %v1652_v6 = vpop.eup %1651 }
 0x152   : > { %v965_v7 = vadd.f32 1.0, %v1652_v6 }
 0x154   : > { %1653 = vrcp.f32 %v965_v7  ;;  %v977_v11 = vand.u32 2147483648, %v965_v7  ;;  %v975_v13 = vand.u32 2147483647, %v965_v7  ;;  %vm971_vm9 = vweird.f32 %v965_v7 }
 0x155   : > { %1655 = vtanh.f32 %v984_v3 }
 0x156   : > { %v978_v15 = vor.u32 1.1754944e-38, %v977_v11  ;;  %vm976_vm11 = vcmp.eq.f32.partialorder %v975_v13, 8.507059e+37 }
 0x15a   : > { %v1654_v8 = vpop.eup %1653 }
 0x15b   : > { %v967_v9 = vmul.f32 %v1654_v8, %v965_v7  ;;  %vm972_vm8 = vweird.f32 %v1654_v8  ;;  %v1656_v17 = vpop.eup %1655 }
 0x15c   : > { %vm973_vm10 = vmor %vm971_vm9, %vm972_vm8 }
 0x15d   : > { %v968_v10 = vsub.f32 1.0, %v967_v9 }
 0x15f   : > { %v969_v12 = vmul.f32 %v1654_v8, %v968_v10 }
 0x161   : > { %v970_v14 = vadd.f32 %v1654_v8, %v969_v12 }
 0x163   : > { %v974_v16 = vsel %vm973_vm10, %v1654_v8, %v970_v14  ;;  %993 = sbr.rel (%p1490_p6) target bundleno = 363 (0x16b), region = 68 }
 0x164   : > { %v979_v18 = vsel %vm976_vm11, %v978_v15, %v974_v16 }
 0x165   : > { %v986_v19 = vmul.f32 %v1656_v17, %v979_v18 }
 0x167   : > { %987 = vst [vmem:[%s401_s19] sm:$0xff] %v986_v19 }
 0x168   : > { %v994_v20 = vpack.c.bf16 %v986_v19, %v986_v19 }
 0x16a   : > { %995 = vst [vmem:[#allocation2] sm:$0xf] %v994_v20 }
 0x16b PF: > { %s1493_s25 = sshll.u32 %s2052_s10, 3  ;;  %s1014_s24 = sshll.u32 %s401_s19, 4  ;;  %s1015_s24 = int_to_ptr.vmem [resolvable:$true] %s1014_s24 }
 0x16c   : > { %s1012_s23 = scalar_lea.hbm %s2365_s5, %s1493_s25  ;;  %s997_s12 = scalar_lea.sflag [#allocation5], %s2130_s30 }
 0x16d   : > { %s1016_s13 = sshll.u32 %s1012_s23, 4  ;;  %s1827_s10 = scalar_lea.hbm %s2365_s5, 16  ;;  %s1017_s13 = int_to_ptr.hbm [resolvable:$true] %s1016_s13 }
 0x16e   : > { %s1821_s0 = sshra.s32 %s1017_s13, 4  ;;  %s1822_s0 = int_to_ptr.hbm [resolvable:$true] %s1821_s0 }
 0x16f   : > { %s1823_s3 = scalar_lea.hbm %s1822_s0, 8  ;;  %p1828_p1 = scmp.lt.s32.totalorder %s1822_s0, %s2365_s5 }
 0x170   : > { %p1824_p8 = scmp.ne.s32.totalorder %s1822_s0, %s1823_s3  ;;  %p1829_p11 = scmp.lt.s32.totalorder %s1827_s10, %s1823_s3 }
 0x172   : > { %p1825_p13 = pnand %p1824_p8, %p2069_p7  ;;  %p1830_p2 = por %p1829_p11, %p1828_p1 }
 0x174   : > { %p1826_p5 = pneg %p1825_p13 }
 0x176   : > { %p1831_p4 = pnand %p1830_p2, %p1826_p5 }
 0x178   : > { %1834 = shalt.err (!%p1831_p4)
}
 0x179   : > { %1574 = dma.vmem_to_hbm [thread:$0]  (%p2069_p7), %s1015_s24, 128, %s1017_s13, %s997_s12  }
 0x17a   : > { %s1026_s9 = scalar_lea.hbm %s2366_s6, %s1493_s25  ;;  %s1028_s14 = sshll.u32 %s408_s17, 4  ;;  %s1029_s14 = int_to_ptr.vmem [resolvable:$true] %s1028_s14 }
 0x17b   : > { %s1030_s19 = sshll.u32 %s1026_s9, 4  ;;  %s1002_s11 = scalar_lea.sflag [#allocation14], %s2130_s30  ;;  %s1031_s19 = int_to_ptr.hbm [resolvable:$true] %s1030_s19 }
 0x17c   : > { %s1849_s26 = sshra.s32 %s1031_s19, 4  ;;  %s1855_s24 = scalar_lea.hbm %s2366_s6, 16  ;;  %s1850_s26 = int_to_ptr.hbm [resolvable:$true] %s1849_s26 }
 0x17d   : > { %s1851_s28 = scalar_lea.hbm %s1850_s26, 8  ;;  %p1856_p3 = scmp.lt.s32.totalorder %s1850_s26, %s2366_s6 }
 0x17e   : > { %p1852_p10 = scmp.ne.s32.totalorder %s1850_s26, %s1851_s28  ;;  %p1857_p6 = scmp.lt.s32.totalorder %s1855_s24, %s1851_s28 }
 0x180   : > { %p1853_p0 = pnand %p1852_p10, %p2069_p7  ;;  %p1858_p8 = por %p1857_p6, %p1856_p3 }
 0x182   : > { %p1854_p12 = pneg %p1853_p0 }
 0x184   : > { %p1859_p13 = pnand %p1858_p8, %p1854_p12 }
 0x186   : > { %1862 = shalt.err (!%p1859_p13)
}
 0x187   : > { %1575 = dma.vmem_to_hbm [thread:$0]  (%p2069_p7), %s1029_s14, 128, %s1031_s19, %s1002_s11  }
 0x188 PF: > { %s2391_s30 = sld [smem:[#allocation21_spill]]  ;;  %s1042_s27 = sand.u32 1, %s1901_s21  }
 0x189   : > { %s1043_s17 = scalar_lea.sflag [#allocation5], %s1042_s27 }
 0x18e   : > { %p2392_p5 = scmp.ge.s32.totalorder %s2391_s30, 2 }
 0x190   : > { %p1596_p1 = pnand %p2392_p5, %p2073_p9 }
 0x192   : > { %p1597_p11 = pneg %p1596_p1 }
 0x194   : > { %1892 = dma.done.wait (%p1597_p11), %s1043_s17, 128  }
 0x195   : > { %1894 = vsyncadd (%p1597_p11), %s1043_s17, 4294967168  ;;  %s1053_s25 = scalar_lea.sflag [#allocation14], %s1042_s27 }
 0x196   : > { %1896 = dma.done.wait (%p1597_p11), %s1053_s25, 128  }
 0x197   : > { %1898 = vsyncadd (%p1597_p11), %s1053_s25, 4294967168  ;;  %s2393_s24 = sld [smem:[#allocation22_spill]]  ;;  %s2396_s21 = smov %s1905_s22 }
 0x198   : > { %s2394_s3 = sld [smem:[#allocation20_spill]] }
 0x199   : > { %s2395_s23 = sld [smem:[#allocation23_spill]] }
 0x19d   : > { %p27_p7 = scmp.ge.s32.totalorder %s2393_s24, 4  }
 0x19e   : > { %s2397_s22 = smov %s2394_s3 }
 0x19f   :  { %29 = sbr.rel (!%p27_p7) target bundleno = 14 (0xe), region = 150 }
 0x1a4   :  { %1059 = vsyncpa [#allocation4], 1 }
 0x1a5   :  { %1061 = vsyncpa [#allocation4 + $0x1], 1 }
 0x1a6   :  { %1062 = vsyncpa [#allocation7], 1 }
 0x1a7   :  { %1064 = vsyncpa [#allocation7 + $0x1], 1 }
 0x1a8   :  { %1065 = vsyncpa [#allocation10], 1 }
 0x1a9   :  { %1067 = vsyncpa [#allocation10 + $0x1], 1 }
 0x1aa   :  { %1068 = vsyncpa [#allocation5], 1 }
 0x1ab   :  { %1070 = vsyncpa [#allocation5 + $0x1], 1 }
 0x1ac   :  { %1071 = vsyncpa [#allocation14], 1 }
 0x1ad   :  { %1073 = vsyncpa [#allocation14 + $0x1], 1 }

</bundles_post_ra>
